<compile_context>
chip_gen: v7x
topology: tpu7x:2x2x1
jax: 0.10.0
libtpu: 0.0.40
codegen_flags: <defaults>
</compile_context>

<pallas_src>
import functools
import math

import jax
import jax.numpy as jnp
from jax.experimental import pallas as pl
from jax.experimental.pallas import tpu as pltpu


def _round_up(x, m):
    return (x + m - 1) // m * m


def qkv_proj_kernel(h_ref, wq_ref, bq_ref, wk_ref, bk_ref, wv_ref, bv_ref,
                    q_ref, k_ref, v_ref, *, scale):
    """Per (node-tile, head) projection.  Q is pre-scaled by 1/sqrt(out_dim)."""
    x = h_ref[...]                                           # (tp, in_dim)
    q_ref[0] = (jnp.dot(x, wq_ref[0], preferred_element_type=jnp.float32)
                + bq_ref[0]) * scale                         # fold scale into Q once
    k_ref[0] = jnp.dot(x, wk_ref[0], preferred_element_type=jnp.float32) + bk_ref[0]
    v_ref[0] = jnp.dot(x, wv_ref[0], preferred_element_type=jnp.float32) + bv_ref[0]


def graph_attention_kernel(q_ref, k_ref, v_ref, adj_ref, o_ref, wv_acc, z_acc):
    """Flash-style masked graph attention, batched over heads.

    q_ref: (H, TM, D)   k_ref/v_ref: (H, TS, D)   adj_ref: (TM, TS) dst-major 0/1
    wv_acc: (H, TM, D) f32 scratch, z_acc: (H, TM, 1) f32 scratch.
    """
    j = pl.program_id(1)

    @pl.when(j == 0)
    def _():
        wv_acc[...] = jnp.zeros_like(wv_acc)
        z_acc[...] = jnp.zeros_like(z_acc)

    # Head-batched dst-major scores (Q already carries the 1/sqrt(D) scale).
    s = jnp.einsum('hmd,hsd->hms', q_ref[...], k_ref[...],
                   preferred_element_type=jnp.float32)        # (H, TM, TS)
    adj = adj_ref[...].astype(jnp.float32)                    # (TM, TS), 0/1 mask
    # Mask after exp so edge scores equal torch.exp(clamp(...)) exactly.
    e = jnp.exp(jnp.clip(s, -5.0, 5.0)) * adj[None, :, :]
    wv_acc[...] += jnp.einsum('hms,hsd->hmd', e, v_ref[...],
                              preferred_element_type=jnp.float32)
    z_acc[...] += jnp.sum(e, axis=-1, keepdims=True)          # lane-axis reduce

    @pl.when(j == pl.num_programs(1) - 1)
    def _():
        # Precondition (same as the DGL module): every real destination node has
        # >= 1 in-edge (e.g. self-loops), so z > 0.  Padded dst rows give NaN and
        # are sliced off by the wrapper.  Exact divide (runs once per dst tile).
        o_ref[...] = (wv_acc[...] / z_acc[...]).astype(o_ref.dtype)


def multi_head_attention(h, wq, bq, wk, bk, wv, bv, adj, *, num_heads, out_dim,
                         dst_tile=256, src_tile=512, vmem_limit_mb=48):
    """adj is [N_src, N_dst]: adj[u, v] = 1.0 iff edge u -> v exists."""
    N, in_dim = h.shape
    D = out_dim
    scale = 1.0 / math.sqrt(out_dim)

    # Tile selection: ts is the lane-dim (src) tile (multiple of 128 or full),
    # tm divides ts so a single padded node count serves Q, K/V and adjacency.
    # vmem_limit_mb=48 keeps headroom on v7x (64 MiB VMEM/TC); raise tiles and
    # the limit on v5e/v6e (128 MiB) if profiling shows per-step overhead.
    ts = min(src_tile, _round_up(N, 128))
    tm = min(dst_tile, ts)
    if ts % tm != 0:
        tm = ts
    tp = ts
    n_pad = _round_up(N, ts)

    h_pad = jnp.pad(h.astype(jnp.float32), ((0, n_pad - N), (0, 0)))

    # Dst-major adjacency, bf16 (exact for a 0/1 mask, halves HBM/VMEM traffic).
    # Padded region is zero, so padded src columns contribute nothing to wV / z.
    # TODO(synk): cache this per graph instead of transposing every call.
    adj_t = jnp.pad(adj.T.astype(jnp.bfloat16), ((0, n_pad - N), (0, n_pad - N)))

    # Head-major weight/bias layout (in a real module this is done once at init).
    wq3 = wq.reshape(in_dim, num_heads, D).transpose(1, 0, 2)
    wk3 = wk.reshape(in_dim, num_heads, D).transpose(1, 0, 2)
    wv3 = wv.reshape(in_dim, num_heads, D).transpose(1, 0, 2)
    bq3 = bq.reshape(num_heads, 1, D)
    bk3 = bk.reshape(num_heads, 1, D)
    bv3 = bv.reshape(num_heads, 1, D)

    vmem_limit = vmem_limit_mb * 1024 * 1024

    # ---------------- Kernel 1: Q/K/V projection (head-major outputs) ----------------
    w_spec = pl.BlockSpec((1, in_dim, D), lambda i, hh: (hh, 0, 0))
    b_spec = pl.BlockSpec((1, 1, D), lambda i, hh: (hh, 0, 0))
    q3, k3, v3 = pl.pallas_call(
        functools.partial(qkv_proj_kernel, scale=scale),
        out_shape=tuple(jax.ShapeDtypeStruct((num_heads, n_pad, D), jnp.float32)
                        for _ in range(3)),
        grid_spec=pltpu.PrefetchScalarGridSpec(
            num_scalar_prefetch=0,
            grid=(n_pad // tp, num_heads),
            in_specs=[
                pl.BlockSpec((tp, in_dim), lambda i, hh: (i, 0)),   # h node tile
                w_spec, b_spec,                                      # Wq, bq
                w_spec, b_spec,                                      # Wk, bk
                w_spec, b_spec,                                      # Wv, bv
            ],
            out_specs=tuple(
                pl.BlockSpec((1, tp, D), lambda i, hh: (hh, i, 0)) for _ in range(3)),
        ),
        compiler_params=pltpu.CompilerParams(
            dimension_semantics=("parallel", "parallel"),
            vmem_limit_bytes=vmem_limit,
        ),
    )(h_pad, wq3, bq3, wk3, bk3, wv3, bv3)

    # ---------------- Kernel 2: flash-style masked graph attention ----------------
    grid = (n_pad // tm, n_pad // ts)
    out = pl.pallas_call(
        graph_attention_kernel,
        out_shape=jax.ShapeDtypeStruct((num_heads, n_pad, D), jnp.float32),
        grid_spec=pltpu.PrefetchScalarGridSpec(
            num_scalar_prefetch=0,
            grid=grid,
            in_specs=[
                pl.BlockSpec((num_heads, tm, D), lambda i, j: (0, i, 0)),  # Q dst tile
                pl.BlockSpec((num_heads, ts, D), lambda i, j: (0, j, 0)),  # K src tile
                pl.BlockSpec((num_heads, ts, D), lambda i, j: (0, j, 0)),  # V src tile
                pl.BlockSpec((tm, ts), lambda i, j: (i, j)),               # adj^T tile
            ],
            out_specs=pl.BlockSpec((num_heads, tm, D), lambda i, j: (0, i, 0)),
            scratch_shapes=[
                pltpu.VMEM((num_heads, tm, D), jnp.float32),   # wV accumulator
                pltpu.VMEM((num_heads, tm, 1), jnp.float32),   # z accumulator (per head)
            ],
        ),
        compiler_params=pltpu.CompilerParams(
            dimension_semantics=("parallel", "arbitrary"),
            vmem_limit_bytes=vmem_limit,
        ),
    )(q3, k3, v3, adj_t)

    head_out = jnp.swapaxes(out, 0, 1)[:N]        # (N, num_heads, out_dim)
    # TODO(synk): CUDA event timing has no Pallas equivalent; return 0.0 placeholder.
    kernel_time = 0.0
    return head_out, kernel_time


def reference_jax(h, wq, bq, wk, bk, wv, bv, adj, *, num_heads, out_dim):
    N = h.shape[0]
    Q = (h @ wq + bq).reshape(N, num_heads, out_dim)
    K = (h @ wk + bk).reshape(N, num_heads, out_dim)
    V = (h @ wv + bv).reshape(N, num_heads, out_dim)
    s = jnp.einsum("uhd,vhd->uvh", K, Q) / math.sqrt(out_dim)
    e = jnp.exp(jnp.clip(s, -5.0, 5.0)) * adj[:, :, None]
    wV = jnp.einsum("uvh,uhd->vhd", e, V)
    z = jnp.sum(e, axis=0)[:, :, None]
    return wV / z


if __name__ == "__main__":
    N, in_dim, out_dim, num_heads = 24, 16, 8, 4
    HD = num_heads * out_dim

    key = jax.random.PRNGKey(0)
    ks = jax.random.split(key, 8)
    h = jax.random.normal(ks[0], (N, in_dim), jnp.float32)
    wq = jax.random.normal(ks[1], (in_dim, HD), jnp.float32) * 0.2
    wk = jax.random.normal(ks[2], (in_dim, HD), jnp.float32) * 0.2
    wv = jax.random.normal(ks[3], (in_dim, HD), jnp.float32) * 0.2
    bq = jax.random.normal(ks[4], (HD,), jnp.float32) * 0.1
    bk = jax.random.normal(ks[5], (HD,), jnp.float32) * 0.1
    bv = jax.random.normal(ks[6], (HD,), jnp.float32) * 0.1

    # Random directed graph with self-loops (every node has >= 1 in-edge, so
    # z > 0 everywhere and wV / z is well defined, as in a typical DGL graph).
    rnd = jax.random.uniform(ks[7], (N, N))
    adj = jnp.minimum(jnp.where(rnd < 0.3, 1.0, 0.0) + jnp.eye(N), 1.0)
    adj = adj.astype(jnp.float32)

    head_out, kernel_time = multi_head_attention(
        h, wq, bq, wk, bk, wv, bv, adj, num_heads=num_heads, out_dim=out_dim)
    head_out = jax.block_until_ready(head_out)

    ref = reference_jax(
        h, wq, bq, wk, bk, wv, bv, adj, num_heads=num_heads, out_dim=out_dim)
    assert head_out.shape == (N, num_heads, out_dim)
    assert jnp.allclose(head_out, ref, atol=1e-4, rtol=1e-4), "mismatch vs reference"

    print("KERNEL_OK")
</pallas_src>

<mosaic_0001>
module attributes {stable_mosaic.version = 11 : i64} {
  func.func @qkv_proj_kernel(%arg0: i32, %arg1: i32, %arg2: memref<128x16xf32, #tpu.memory_space<vmem>>, %arg3: memref<1x16x8xf32, #tpu.memory_space<vmem>>, %arg4: memref<1x1x8xf32, #tpu.memory_space<vmem>>, %arg5: memref<1x16x8xf32, #tpu.memory_space<vmem>>, %arg6: memref<1x1x8xf32, #tpu.memory_space<vmem>>, %arg7: memref<1x16x8xf32, #tpu.memory_space<vmem>>, %arg8: memref<1x1x8xf32, #tpu.memory_space<vmem>>, %arg9: memref<1x128x8xf32, #tpu.memory_space<vmem>>, %arg10: memref<1x128x8xf32, #tpu.memory_space<vmem>>, %arg11: memref<1x128x8xf32, #tpu.memory_space<vmem>>) attributes {dimension_semantics = [#tpu.dimension_semantics<parallel>, #tpu.dimension_semantics<parallel>], iteration_bounds = array<i64: 1, 4>, scalar_prefetch = 0 : i64, scratch_operands = 0 : i64, tpu.core_type = #tpu.core_type<tc>, window_params = [{transform_indices = @transform_0, window_bounds = array<i64: 128, 16>}, {transform_indices = @transform_1, window_bounds = array<i64: 1, 16, 8>}, {transform_indices = @transform_2, window_bounds = array<i64: 1, 1, 8>}, {transform_indices = @transform_3, window_bounds = array<i64: 1, 16, 8>}, {transform_indices = @transform_4, window_bounds = array<i64: 1, 1, 8>}, {transform_indices = @transform_5, window_bounds = array<i64: 1, 16, 8>}, {transform_indices = @transform_6, window_bounds = array<i64: 1, 1, 8>}, {transform_indices = @transform_7, window_bounds = array<i64: 1, 128, 8>}, {transform_indices = @transform_8, window_bounds = array<i64: 1, 128, 8>}, {transform_indices = @transform_9, window_bounds = array<i64: 1, 128, 8>}]} {
    %c0 = arith.constant 0 : index
    %c0_0 = arith.constant 0 : index
    %0 = vector.load %arg2[%c0, %c0_0] : memref<128x16xf32, #tpu.memory_space<vmem>>, vector<128x16xf32>
    %c0_1 = arith.constant 0 : index
    %c0_2 = arith.constant 0 : index
    %c0_3 = arith.constant 0 : index
    %1 = vector.load %arg3[%c0_1, %c0_2, %c0_3] : memref<1x16x8xf32, #tpu.memory_space<vmem>>, vector<1x16x8xf32>
    %2 = vector.shape_cast %1 : vector<1x16x8xf32> to vector<16x8xf32>
    %cst = arith.constant dense<0.000000e+00> : vector<128x8xf32>
    %3 = tpu.matmul %0, %2, %cst {dimension_numbers = #tpu.dot_dimension_numbers<[1], [0], [0], [1], [0, 0, 1, 1], [], []>} : vector<128x16xf32>, vector<16x8xf32>, vector<128x8xf32> -> vector<128x8xf32>
    %c0_4 = arith.constant 0 : index
    %c0_5 = arith.constant 0 : index
    %c0_6 = arith.constant 0 : index
    %4 = vector.load %arg4[%c0_4, %c0_5, %c0_6] : memref<1x1x8xf32, #tpu.memory_space<vmem>>, vector<1x1x8xf32>
    %5 = vector.shape_cast %4 : vector<1x1x8xf32> to vector<1x8xf32>
    %6 = vector.broadcast %5 : vector<1x8xf32> to vector<128x8xf32>
    %7 = arith.addf %3, %6 : vector<128x8xf32>
    %cst_7 = arith.constant 0.353553385 : f32
    %8 = vector.broadcast %cst_7 : f32 to vector<128x8xf32>
    %9 = arith.mulf %7, %8 : vector<128x8xf32>
    %c0_8 = arith.constant 0 : index
    %c0_9 = arith.constant 0 : index
    %c0_10 = arith.constant 0 : index
    %10 = vector.load %arg9[%c0_8, %c0_9, %c0_10] : memref<1x128x8xf32, #tpu.memory_space<vmem>>, vector<1x128x8xf32>
    %11 = vector.shape_cast %10 : vector<1x128x8xf32> to vector<128x8xf32>
    %12 = vector.shape_cast %9 : vector<128x8xf32> to vector<1x128x8xf32>
    tpu.vector_store %arg9[%c0_8, %c0_9, %c0_10], %12 {strides = array<i32>} : memref<1x128x8xf32, #tpu.memory_space<vmem>>, vector<1x128x8xf32>,
    %c0_11 = arith.constant 0 : index
    %c0_12 = arith.constant 0 : index
    %c0_13 = arith.constant 0 : index
    %13 = vector.load %arg5[%c0_11, %c0_12, %c0_13] : memref<1x16x8xf32, #tpu.memory_space<vmem>>, vector<1x16x8xf32>
    %14 = vector.shape_cast %13 : vector<1x16x8xf32> to vector<16x8xf32>
    %cst_14 = arith.constant dense<0.000000e+00> : vector<128x8xf32>
    %15 = tpu.matmul %0, %14, %cst_14 {dimension_numbers = #tpu.dot_dimension_numbers<[1], [0], [0], [1], [0, 0, 1, 1], [], []>} : vector<128x16xf32>, vector<16x8xf32>, vector<128x8xf32> -> vector<128x8xf32>
    %c0_15 = arith.constant 0 : index
    %c0_16 = arith.constant 0 : index
    %c0_17 = arith.constant 0 : index
    %16 = vector.load %arg6[%c0_15, %c0_16, %c0_17] : memref<1x1x8xf32, #tpu.memory_space<vmem>>, vector<1x1x8xf32>
    %17 = vector.shape_cast %16 : vector<1x1x8xf32> to vector<1x8xf32>
    %18 = vector.broadcast %17 : vector<1x8xf32> to vector<128x8xf32>
    %19 = arith.addf %15, %18 : vector<128x8xf32>
    %c0_18 = arith.constant 0 : index
    %c0_19 = arith.constant 0 : index
    %c0_20 = arith.constant 0 : index
    %20 = vector.load %arg10[%c0_18, %c0_19, %c0_20] : memref<1x128x8xf32, #tpu.memory_space<vmem>>, vector<1x128x8xf32>
    %21 = vector.shape_cast %20 : vector<1x128x8xf32> to vector<128x8xf32>
    %22 = vector.shape_cast %19 : vector<128x8xf32> to vector<1x128x8xf32>
    tpu.vector_store %arg10[%c0_18, %c0_19, %c0_20], %22 {strides = array<i32>} : memref<1x128x8xf32, #tpu.memory_space<vmem>>, vector<1x128x8xf32>,
    %c0_21 = arith.constant 0 : index
    %c0_22 = arith.constant 0 : index
    %c0_23 = arith.constant 0 : index
    %23 = vector.load %arg7[%c0_21, %c0_22, %c0_23] : memref<1x16x8xf32, #tpu.memory_space<vmem>>, vector<1x16x8xf32>
    %24 = vector.shape_cast %23 : vector<1x16x8xf32> to vector<16x8xf32>
    %cst_24 = arith.constant dense<0.000000e+00> : vector<128x8xf32>
    %25 = tpu.matmul %0, %24, %cst_24 {dimension_numbers = #tpu.dot_dimension_numbers<[1], [0], [0], [1], [0, 0, 1, 1], [], []>} : vector<128x16xf32>, vector<16x8xf32>, vector<128x8xf32> -> vector<128x8xf32>
    %c0_25 = arith.constant 0 : index
    %c0_26 = arith.constant 0 : index
    %c0_27 = arith.constant 0 : index
    %26 = vector.load %arg8[%c0_25, %c0_26, %c0_27] : memref<1x1x8xf32, #tpu.memory_space<vmem>>, vector<1x1x8xf32>
    %27 = vector.shape_cast %26 : vector<1x1x8xf32> to vector<1x8xf32>
    %28 = vector.broadcast %27 : vector<1x8xf32> to vector<128x8xf32>
    %29 = arith.addf %25, %28 : vector<128x8xf32>
    %c0_28 = arith.constant 0 : index
    %c0_29 = arith.constant 0 : index
    %c0_30 = arith.constant 0 : index
    %30 = vector.load %arg11[%c0_28, %c0_29, %c0_30] : memref<1x128x8xf32, #tpu.memory_space<vmem>>, vector<1x128x8xf32>
    %31 = vector.shape_cast %30 : vector<1x128x8xf32> to vector<128x8xf32>
    %32 = vector.shape_cast %29 : vector<128x8xf32> to vector<1x128x8xf32>
    tpu.vector_store %arg11[%c0_28, %c0_29, %c0_30], %32 {strides = array<i32>} : memref<1x128x8xf32, #tpu.memory_space<vmem>>, vector<1x128x8xf32>,
    return
  }
  func.func @transform_0(%arg0: i32, %arg1: i32) -> (i32, i32) {
    %c0_i32 = arith.constant 0 : i32
    %c0_i32_0 = arith.constant 0 : i32
    return %arg0, %c0_i32 : i32, i32
  }
  func.func @transform_1(%arg0: i32, %arg1: i32) -> (i32, i32, i32) {
    %c0_i32 = arith.constant 0 : i32
    %c0_i32_0 = arith.constant 0 : i32
    %c0_i32_1 = arith.constant 0 : i32
    return %arg1, %c0_i32, %c0_i32_0 : i32, i32, i32
  }
  func.func @transform_2(%arg0: i32, %arg1: i32) -> (i32, i32, i32) {
    %c0_i32 = arith.constant 0 : i32
    %c0_i32_0 = arith.constant 0 : i32
    %c0_i32_1 = arith.constant 0 : i32
    return %arg1, %c0_i32, %c0_i32_0 : i32, i32, i32
  }
  func.func @transform_3(%arg0: i32, %arg1: i32) -> (i32, i32, i32) {
    %c0_i32 = arith.constant 0 : i32
    %c0_i32_0 = arith.constant 0 : i32
    %c0_i32_1 = arith.constant 0 : i32
    return %arg1, %c0_i32, %c0_i32_0 : i32, i32, i32
  }
  func.func @transform_4(%arg0: i32, %arg1: i32) -> (i32, i32, i32) {
    %c0_i32 = arith.constant 0 : i32
    %c0_i32_0 = arith.constant 0 : i32
    %c0_i32_1 = arith.constant 0 : i32
    return %arg1, %c0_i32, %c0_i32_0 : i32, i32, i32
  }
  func.func @transform_5(%arg0: i32, %arg1: i32) -> (i32, i32, i32) {
    %c0_i32 = arith.constant 0 : i32
    %c0_i32_0 = arith.constant 0 : i32
    %c0_i32_1 = arith.constant 0 : i32
    return %arg1, %c0_i32, %c0_i32_0 : i32, i32, i32
  }
  func.func @transform_6(%arg0: i32, %arg1: i32) -> (i32, i32, i32) {
    %c0_i32 = arith.constant 0 : i32
    %c0_i32_0 = arith.constant 0 : i32
    %c0_i32_1 = arith.constant 0 : i32
    return %arg1, %c0_i32, %c0_i32_0 : i32, i32, i32
  }
  func.func @transform_7(%arg0: i32, %arg1: i32) -> (i32, i32, i32) {
    %c0_i32 = arith.constant 0 : i32
    %c0_i32_0 = arith.constant 0 : i32
    return %arg1, %arg0, %c0_i32 : i32, i32, i32
  }
  func.func @transform_8(%arg0: i32, %arg1: i32) -> (i32, i32, i32) {
    %c0_i32 = arith.constant 0 : i32
    %c0_i32_0 = arith.constant 0 : i32
    return %arg1, %arg0, %c0_i32 : i32, i32, i32
  }
  func.func @transform_9(%arg0: i32, %arg1: i32) -> (i32, i32, i32) {
    %c0_i32 = arith.constant 0 : i32
    %c0_i32_0 = arith.constant 0 : i32
    return %arg1, %arg0, %c0_i32 : i32, i32, i32
  }
}

</mosaic_0001>

<bundles_post_ra>
// kernel: tpu_custom_call.1
= control target key start
LH: loop header
LB: loop body
LE: loop exit
PB: predicated region body
PF: predicated region fallthrough
CT: control target
= control target key end

     0   :  { %s1673_s30 = smov 0   ;;  %s1675_s10 = smov 0   ;;  %s1978_s0 = inlined_call_operand.vmem [shape: f32[128,16], index: 0, kind: input, shape index: {}]   ;;  %s1979_s1 = inlined_call_operand.vmem [shape: f32[4,16,8], index: 1, kind: input, shape index: {}]   ;;  %s1980_s2 = inlined_call_operand.vmem [shape: f32[4,1,8], index: 2, kind: input, shape index: {}]   ;;  %s1981_s3 = inlined_call_operand.vmem [shape: f32[4,16,8], index: 3, kind: input, shape index: {}]   ;;  %s1982_s4 = inlined_call_operand.vmem [shape: f32[4,1,8], index: 4, kind: input, shape index: {}]   ;;  %s1983_s5 = inlined_call_operand.vmem [shape: f32[4,16,8], index: 5, kind: input, shape index: {}]   ;;  %s1984_s6 = inlined_call_operand.vmem [shape: f32[4,1,8], index: 6, kind: input, shape index: {}]   ;;  %s1985_s7 = inlined_call_operand.vmem [shape: f32[4,128,8], index: 7, kind: output, shape index: {0}]   ;;  %s1986_s8 = inlined_call_operand.vmem [shape: f32[4,128,8], index: 8, kind: output, shape index: {1}]   ;;  %s1987_s9 = inlined_call_operand.vmem [shape: f32[4,128,8], index: 9, kind: output, shape index: {2}]  }
   0x1   :  { %s1677_s11 = smov 0  }
   0x2 LB: > { %s29_s12 = sadd.s32 1, %s1617_s10  ;;  %p1351_p0 = scmp.ge.s32.totalorder %s1621_s11, 1  ;;  %s1621_s11 = sphi %s1677_s11, %s20_s11   ;;  %s1617_s10 = sphi %s1675_s10, %s1989_s10   ;;  %s1613_s30 = sphi %s1673_s30, %s1988_s30  }
   0x3   : > { %p30_p1 = scmp.ge.s32.totalorder %s29_s12, 4  ;;  %p365_p2 = scmp.lt.s32.totalorder %s1621_s11, 5 }
   0x5   : > { %s1991_s12 = smov (%p30_p1, %s29_s12), 0  ;;  %p366_p3 = pnand %p1351_p0, %p365_p2 }
   0x6   : > { %p453_p4 = scmp.lt.s32.totalorder (!%p366_p3), %s1613_s30, 3  ;;  %v507_v0 = vld [vmem:[%s1978_s0] sm:$0xff] (!%p366_p3)  ;;  %vm532_vm0 = vcmask (!%p366_p3), 130048   ;;  %v508_v11 = vld [vmem:[%s1978_s0 + $0x8] sm:$0xff] (!%p366_p3)  ;;  %v509_v13 = vld [vmem:[%s1978_s0 + $0x10] sm:$0xff] (!%p366_p3)  ;;  %vm742_vm1 = vcmask (!%p366_p3), 64512  }
   0x7   : > { %369 = sbr.rel (%p366_p3) target bundleno = 284 (0x11c), region = 48  ;;  %v1697_v1 = vld [vmem:[%s1978_s0 + $0x40] sm:$0xff] (!%p366_p3)  ;;  %1481 = vmatprep.mubr.msk.f32.mxu0 (!%p366_p3), %vm532_vm0, %v507_v0  ;;  %v516_v12 = vld [vmem:[%s1978_s0 + $0x48] sm:$0xff] (!%p366_p3)  ;;  %v517_v14 = vld [vmem:[%s1978_s0 + $0x50] sm:$0xff] (!%p366_p3) }
   0x8   : > { %1493 = vmatprep.mubr.msk.f32.mxu1 (!%p366_p3), %vm532_vm0, %v1697_v1  ;;  %v510_v15 = vld [vmem:[%s1978_s0 + $0x18] sm:$0xff] (!%p366_p3)  ;;  %v511_v17 = vld [vmem:[%s1978_s0 + $0x20] sm:$0xff] (!%p366_p3)  ;;  %v512_v19 = vld [vmem:[%s1978_s0 + $0x28] sm:$0xff] (!%p366_p3) }
   0x9   : > { %v518_v16 = vld [vmem:[%s1978_s0 + $0x58] sm:$0xff] (!%p366_p3)  ;;  %v519_v18 = vld [vmem:[%s1978_s0 + $0x60] sm:$0xff] (!%p366_p3)  ;;  %v520_v20 = vld [vmem:[%s1978_s0 + $0x68] sm:$0xff] (!%p366_p3) }
   0xa   : > { %v513_v21 = vld [vmem:[%s1978_s0 + $0x30] sm:$0xff] (!%p366_p3)  ;;  %v514_v23 = vld [vmem:[%s1978_s0 + $0x38] sm:$0xff] (!%p366_p3) }
   0xb   : > { %v521_v22 = vld [vmem:[%s1978_s0 + $0x70] sm:$0xff] (!%p366_p3)  ;;  %v522_v24 = vld [vmem:[%s1978_s0 + $0x78] sm:$0xff] (!%p366_p3) }
   0xe   : > { %s1993_s30 = smov (!%p453_p4, %s1613_s30), 3 }
   0xf   : > { %s1417_s17 = sshll.u32 %s1993_s30, 4  ;;  %s1809_s24 = sshll.u32 %s1993_s30, 7 }
  0x10   : > { %s457_s20 = scalar_lea.vmem %s1979_s1, %s1417_s17  ;;  %s465_s23 = scalar_lea.vmem %s1981_s3, %s1417_s17 }
  0x11   : > { %v523_v2 = vld [vmem:[%s457_s20] sm:$0xff]  ;;  %v524_v3 = vld [vmem:[%s457_s20 + $0x8] sm:$0xff]  ;;  %s473_s26 = scalar_lea.vmem %s1983_s5, %s1417_s17  ;;  %s1815_s27 = scalar_lea.vmem %s1985_s7, %s1809_s24 }
  0x12   : > { %v759_v4 = vld [vmem:[%s465_s23] sm:$0xff]  ;;  %v1561_v5 = vpack.c.bf16 %v524_v3, %v523_v2  ;;  %v760_v6 = vld [vmem:[%s465_s23 + $0x8] sm:$0xff]  ;;  %s460_s23 = scalar_lea.vmem %s1980_s2, %s1993_s30  ;;  %s468_s13 = scalar_lea.vmem %s1982_s4, %s1993_s30 }
  0x13   : > { %v929_v7 = vld [vmem:[%s473_s26] sm:$0xff]  ;;  %v930_v8 = vld [vmem:[%s473_s26 + $0x8] sm:$0xff]  ;;  %v1565_v9 = vpack.c.bf16 %v760_v6, %v759_v4  ;;  %s476_s16 = scalar_lea.vmem %s1984_s6, %s1993_s30  ;;  %s1857_s18 = scalar_lea.vmem %s1986_s8, %s1809_s24 }
  0x14   : > { %v1569_v10 = vpack.c.bf16 %v930_v8, %v929_v7  ;;  %1562 = vmatprep.subr.bf16.mxu0 %v1561_v5  ;;  %1573 = vmatprep.subr.bf16.mxu1 %v1561_v5  ;;  %v1364_v25 = vld [vmem:[%s460_s23] ss:$0 sm:$0xff]  ;;  %s1863_s21 = scalar_lea.vmem %s1987_s9, %s1809_s24 }
  0x15   : > { %1564 = vmatpush3.bf16.msra.mxu0 %v1561_v5  ;;  %1574 = vmatpush3.bf16.msra.mxu1 %v1561_v5  ;;  %v1849_v6 = vld [vmem:[%s468_s13] ss:$0 sm:$0xff] }
  0x16   : > { %1566 = vmatprep.subr.bf16.mxu1 %v1565_v9  ;;  %1570 = vmatprep.subr.bf16.mxu0 %v1569_v10  ;;  %v1851_v7 = vld [vmem:[%s476_s16] ss:$0 sm:$0xff] }
  0x18   : > { %1482 = vmatmul.mubr.msk.f32.vlgmr.msra.gmra.mrb[0].mxu0 %vm532_vm0, %v508_v11  ;;  %1494 = vmatmul.mubr.msk.f32.vlgmr.msra.gmra.mrb[0].mxu1 %vm532_vm0, %v516_v12 }
  0x19   : > { %1568 = vmatpush3.bf16.msra.mxu1 %v1565_v9  ;;  %1572 = vmatpush3.bf16.msra.mxu0 %v1569_v10 }
  0x1a   : > { %1484 = vmatprep.mubr.msk.f32.mxu0 %vm532_vm0, %v509_v13  ;;  %1496 = vmatprep.mubr.msk.f32.mxu1 %vm532_vm0, %v517_v14 }
  0x1c   : > { %1485 = vmatmul.mubr.msk.f32.gmra.mrb[2].mxu0 %vm532_vm0, %v510_v15  ;;  %1497 = vmatmul.mubr.msk.f32.gmra.mrb[2].mxu1 %vm532_vm0, %v518_v16 }
  0x1d   : > { %1487 = vmatprep.mubr.msk.f32.mxu0 %vm532_vm0, %v511_v17  ;;  %1499 = vmatprep.mubr.msk.f32.mxu1 %vm532_vm0, %v519_v18 }
  0x20   : > { %1488 = vmatmul.mubr.msk.f32.gmra.mrb[4].mxu0 %vm532_vm0, %v512_v19  ;;  %1500 = vmatmul.mubr.msk.f32.gmra.mrb[4].mxu1 %vm532_vm0, %v520_v20 }
  0x21   : > { %1490 = vmatprep.mubr.msk.f32.mxu0 %vm532_vm0, %v513_v21  ;;  %1502 = vmatprep.mubr.msk.f32.mxu1 %vm532_vm0, %v521_v22 }
  0x24   : > { %1491 = vmatmul.mubr.msk.f32.gmra.mrb[6].mxu0 %vm532_vm0, %v514_v23  ;;  %1503 = vmatmul.mubr.msk.f32.gmra.mrb[6].mxu1 %vm532_vm0, %v522_v24 }
  0x25   : > { %1509 = vmatprep.mubr.msk.f32.mxu1 %vm532_vm0, %v507_v0  ;;  %1537 = vmatprep.mubr.msk.f32.mxu0 %vm532_vm0, %v507_v0 }
  0x28   : > { %1510 = vmatmul.mubr.msk.f32.vlgmr.msra.gmra.mrb[8].mxu1 %vm532_vm0, %v508_v11  ;;  %1538 = vmatmul.mubr.msk.f32.vlgmr.msra.gmra.mrb[8].mxu0 %vm532_vm0, %v508_v11 }
  0x29   : > { %1512 = vmatprep.mubr.msk.f32.mxu1 %vm532_vm0, %v509_v13  ;;  %1540 = vmatprep.mubr.msk.f32.mxu0 %vm532_vm0, %v509_v13 }
  0x2c   : > { %1513 = vmatmul.mubr.msk.f32.gmra.mrb[10].mxu1 %vm532_vm0, %v510_v15  ;;  %1541 = vmatmul.mubr.msk.f32.gmra.mrb[10].mxu0 %vm532_vm0, %v510_v15 }
  0x2d   : > { %1515 = vmatprep.mubr.msk.f32.mxu1 %vm532_vm0, %v511_v17  ;;  %1543 = vmatprep.mubr.msk.f32.mxu0 %vm532_vm0, %v511_v17 }
  0x30   : > { %1516 = vmatmul.mubr.msk.f32.gmra.mrb[12].mxu1 %vm532_vm0, %v512_v19  ;;  %1544 = vmatmul.mubr.msk.f32.gmra.mrb[12].mxu0 %vm532_vm0, %v512_v19 }
  0x31   : > { %1518 = vmatprep.mubr.msk.f32.mxu1 %vm532_vm0, %v513_v21  ;;  %1546 = vmatprep.mubr.msk.f32.mxu0 %vm532_vm0, %v513_v21 }
  0x34   : > { %1519 = vmatmul.mubr.msk.f32.gmra.mrb[14].mxu1 %vm532_vm0, %v514_v23  ;;  %1547 = vmatmul.mubr.msk.f32.gmra.mrb[14].mxu0 %vm532_vm0, %v514_v23 }
  0x35   : > { %1521 = vmatprep.mubr.msk.f32.mxu1 %vm532_vm0, %v1697_v1  ;;  %1549 = vmatprep.mubr.msk.f32.mxu0 %vm532_vm0, %v1697_v1 }
  0x38   : > { %1522 = vmatmul.mubr.msk.f32.gmra.mrb[16].mxu1 %vm532_vm0, %v516_v12  ;;  %1550 = vmatmul.mubr.msk.f32.gmra.mrb[16].mxu0 %vm532_vm0, %v516_v12 }
  0x39   : > { %1524 = vmatprep.mubr.msk.f32.mxu1 %vm532_vm0, %v517_v14  ;;  %1552 = vmatprep.mubr.msk.f32.mxu0 %vm532_vm0, %v517_v14 }
  0x3c   : > { %1525 = vmatmul.mubr.msk.f32.gmra.mrb[18].mxu1 %vm532_vm0, %v518_v16  ;;  %1553 = vmatmul.mubr.msk.f32.gmra.mrb[18].mxu0 %vm532_vm0, %v518_v16 }
  0x3d   : > { %1527 = vmatprep.mubr.msk.f32.mxu1 %vm532_vm0, %v519_v18  ;;  %1555 = vmatprep.mubr.msk.f32.mxu0 %vm532_vm0, %v519_v18 }
  0x40   : > { %1528 = vmatmul.mubr.msk.f32.gmra.mrb[20].mxu1 %vm532_vm0, %v520_v20  ;;  %1556 = vmatmul.mubr.msk.f32.gmra.mrb[20].mxu0 %vm532_vm0, %v520_v20 }
  0x41   : > { %1530 = vmatprep.mubr.msk.f32.mxu1 %vm532_vm0, %v521_v22  ;;  %1558 = vmatprep.mubr.msk.f32.mxu0 %vm532_vm0, %v521_v22 }
  0x44   : > { %1531 = vmatmul.mubr.msk.f32.gmra.mrb[22].mxu1 %vm532_vm0, %v522_v24  ;;  %1559 = vmatmul.mubr.msk.f32.gmra.mrb[22].mxu0 %vm532_vm0, %v522_v24 }
  0xeb   : > { %v1483_v26 = vpop.f32.mrb[0].mxu0  ;;  %v1495_v27 = vpop.f32.mrb[0].mxu1 }
  0xec   : > { %v653_v28 = vadd.f32 %v1483_v26, %v1364_v25  ;;  %v693_v29 = vadd.f32 %v1495_v27, %v1364_v25  ;;  %v647_v30 = vpop.f32.mrb[1].mxu0  ;;  %v687_v31 = vpop.f32.mrb[1].mxu1 }
  0xed   : > { %v648_v32 = vadd.f32 %v1364_v25, %v647_v30  ;;  %v688_v33 = vadd.f32 %v1364_v25, %v687_v31 }
  0xee   : > { %v727_v34 = vmul.f32 0.35355338, %v653_v28  ;;  %v735_v35 = vmul.f32 0.35355338, %v693_v29 }
  0xef   : > { %v726_v36 = vmul.f32 0.35355338, %v648_v32  ;;  %v734_v37 = vmul.f32 0.35355338, %v688_v33  ;;  %v1486_v38 = vpop.f32.mrb[2].mxu0  ;;  %v1498_v39 = vpop.f32.mrb[2].mxu1 }
  0xf0   : > { %744 = vst.msk [vmem:[%s1815_s27 + $0x8] sm:$0xff] %vm742_vm1, %v727_v34  ;;  %752 = vst.msk [vmem:[%s1815_s27 + $0x48] sm:$0xff] %vm742_vm1, %v735_v35  ;;  %v663_v40 = vadd.f32 %v1486_v38, %v1364_v25  ;;  %v703_v41 = vadd.f32 %v1498_v39, %v1364_v25  ;;  %v657_v42 = vpop.f32.mrb[3].mxu0  ;;  %v697_v43 = vpop.f32.mrb[3].mxu1 }
  0xf1   : > { %743 = vst.msk [vmem:[%s1815_s27] sm:$0xff] %vm742_vm1, %v726_v36  ;;  %751 = vst.msk [vmem:[%s1815_s27 + $0x40] sm:$0xff] %vm742_vm1, %v734_v37  ;;  %v658_v44 = vadd.f32 %v1364_v25, %v657_v42  ;;  %v698_v45 = vadd.f32 %v1364_v25, %v697_v43 }
  0xf2   : > { %v729_v46 = vmul.f32 0.35355338, %v663_v40  ;;  %v737_v47 = vmul.f32 0.35355338, %v703_v41 }
  0xf3   : > { %v728_v48 = vmul.f32 0.35355338, %v658_v44  ;;  %v736_v49 = vmul.f32 0.35355338, %v698_v45  ;;  %v1489_v50 = vpop.f32.mrb[4].mxu0  ;;  %v1501_v51 = vpop.f32.mrb[4].mxu1 }
  0xf4   : > { %746 = vst.msk [vmem:[%s1815_s27 + $0x18] sm:$0xff] %vm742_vm1, %v729_v46  ;;  %754 = vst.msk [vmem:[%s1815_s27 + $0x58] sm:$0xff] %vm742_vm1, %v737_v47  ;;  %v673_v52 = vadd.f32 %v1489_v50, %v1364_v25  ;;  %v713_v53 = vadd.f32 %v1501_v51, %v1364_v25  ;;  %v667_v54 = vpop.f32.mrb[5].mxu0  ;;  %v707_v55 = vpop.f32.mrb[5].mxu1 }
  0xf5   : > { %745 = vst.msk [vmem:[%s1815_s27 + $0x10] sm:$0xff] %vm742_vm1, %v728_v48  ;;  %753 = vst.msk [vmem:[%s1815_s27 + $0x50] sm:$0xff] %vm742_vm1, %v736_v49  ;;  %v668_v56 = vadd.f32 %v1364_v25, %v667_v54  ;;  %v708_v57 = vadd.f32 %v1364_v25, %v707_v55 }
  0xf6   : > { %v731_v58 = vmul.f32 0.35355338, %v673_v52  ;;  %v739_v59 = vmul.f32 0.35355338, %v713_v53 }
  0xf7   : > { %v730_v60 = vmul.f32 0.35355338, %v668_v56  ;;  %v738_v61 = vmul.f32 0.35355338, %v708_v57  ;;  %v1492_v62 = vpop.f32.mrb[6].mxu0  ;;  %v1504_v63 = vpop.f32.mrb[6].mxu1 }
  0xf8   : > { %748 = vst.msk [vmem:[%s1815_s27 + $0x28] sm:$0xff] %vm742_vm1, %v731_v58  ;;  %756 = vst.msk [vmem:[%s1815_s27 + $0x68] sm:$0xff] %vm742_vm1, %v739_v59  ;;  %v683_v0 = vadd.f32 %v1492_v62, %v1364_v25  ;;  %v723_v1 = vadd.f32 %v1504_v63, %v1364_v25  ;;  %v677_v2 = vpop.f32.mrb[7].mxu0  ;;  %v717_v3 = vpop.f32.mrb[7].mxu1 }
  0xf9   : > { %747 = vst.msk [vmem:[%s1815_s27 + $0x20] sm:$0xff] %vm742_vm1, %v730_v60  ;;  %755 = vst.msk [vmem:[%s1815_s27 + $0x60] sm:$0xff] %vm742_vm1, %v738_v61  ;;  %v678_v4 = vadd.f32 %v1364_v25, %v677_v2  ;;  %v718_v5 = vadd.f32 %v1364_v25, %v717_v3 }
  0xfa   : > { %v733_v8 = vmul.f32 0.35355338, %v683_v0  ;;  %v741_v9 = vmul.f32 0.35355338, %v723_v1 }
  0xfb   : > { %v732_v10 = vmul.f32 0.35355338, %v678_v4  ;;  %v740_v11 = vmul.f32 0.35355338, %v718_v5  ;;  %v1511_v12 = vpop.f32.mrb[8].mxu1  ;;  %v1539_v13 = vpop.f32.mrb[8].mxu0 }
  0xfc   : > { %750 = vst.msk [vmem:[%s1815_s27 + $0x38] sm:$0xff] %vm742_vm1, %v733_v8  ;;  %758 = vst.msk [vmem:[%s1815_s27 + $0x78] sm:$0xff] %vm742_vm1, %v741_v9  ;;  %v840_v14 = vadd.f32 %v1511_v12, %v1849_v6  ;;  %v1010_v15 = vadd.f32 %v1539_v13, %v1851_v7  ;;  %v834_v16 = vpop.f32.mrb[9].mxu1  ;;  %v1004_v17 = vpop.f32.mrb[9].mxu0 }
  0xfd   : > { %749 = vst.msk [vmem:[%s1815_s27 + $0x30] sm:$0xff] %vm742_vm1, %v732_v10  ;;  %757 = vst.msk [vmem:[%s1815_s27 + $0x70] sm:$0xff] %vm742_vm1, %v740_v11  ;;  %v835_v18 = vadd.f32 %v1849_v6, %v834_v16  ;;  %v1005_v19 = vadd.f32 %v1851_v7, %v1004_v17 }
  0xfe   : > { %914 = vst.msk [vmem:[%s1857_s18 + $0x8] sm:$0xff] %vm742_vm1, %v840_v14  ;;  %1084 = vst.msk [vmem:[%s1863_s21 + $0x8] sm:$0xff] %vm742_vm1, %v1010_v15 }
  0xff   : > { %913 = vst.msk [vmem:[%s1857_s18] sm:$0xff] %vm742_vm1, %v835_v18  ;;  %1083 = vst.msk [vmem:[%s1863_s21] sm:$0xff] %vm742_vm1, %v1005_v19  ;;  %v1514_v20 = vpop.f32.mrb[10].mxu1  ;;  %v1542_v21 = vpop.f32.mrb[10].mxu0 }
 0x100   : > { %v850_v22 = vadd.f32 %v1514_v20, %v1849_v6  ;;  %v1020_v23 = vadd.f32 %v1542_v21, %v1851_v7  ;;  %v844_v24 = vpop.f32.mrb[11].mxu1  ;;  %v1014_v25 = vpop.f32.mrb[11].mxu0 }
 0x101   : > { %v845_v26 = vadd.f32 %v1849_v6, %v844_v24  ;;  %v1015_v27 = vadd.f32 %v1851_v7, %v1014_v25 }
 0x102   : > { %916 = vst.msk [vmem:[%s1857_s18 + $0x18] sm:$0xff] %vm742_vm1, %v850_v22  ;;  %1086 = vst.msk [vmem:[%s1863_s21 + $0x18] sm:$0xff] %vm742_vm1, %v1020_v23 }
 0x103   : > { %915 = vst.msk [vmem:[%s1857_s18 + $0x10] sm:$0xff] %vm742_vm1, %v845_v26  ;;  %1085 = vst.msk [vmem:[%s1863_s21 + $0x10] sm:$0xff] %vm742_vm1, %v1015_v27  ;;  %v1517_v28 = vpop.f32.mrb[12].mxu1  ;;  %v1545_v29 = vpop.f32.mrb[12].mxu0 }
 0x104   : > { %v860_v30 = vadd.f32 %v1517_v28, %v1849_v6  ;;  %v1030_v31 = vadd.f32 %v1545_v29, %v1851_v7  ;;  %v854_v32 = vpop.f32.mrb[13].mxu1  ;;  %v1024_v33 = vpop.f32.mrb[13].mxu0 }
 0x105   : > { %v855_v34 = vadd.f32 %v1849_v6, %v854_v32  ;;  %v1025_v35 = vadd.f32 %v1851_v7, %v1024_v33 }
 0x106   : > { %918 = vst.msk [vmem:[%s1857_s18 + $0x28] sm:$0xff] %vm742_vm1, %v860_v30  ;;  %1088 = vst.msk [vmem:[%s1863_s21 + $0x28] sm:$0xff] %vm742_vm1, %v1030_v31 }
 0x107   : > { %917 = vst.msk [vmem:[%s1857_s18 + $0x20] sm:$0xff] %vm742_vm1, %v855_v34  ;;  %1087 = vst.msk [vmem:[%s1863_s21 + $0x20] sm:$0xff] %vm742_vm1, %v1025_v35  ;;  %v1520_v36 = vpop.f32.mrb[14].mxu1  ;;  %v1548_v37 = vpop.f32.mrb[14].mxu0 }
 0x108   : > { %v870_v38 = vadd.f32 %v1520_v36, %v1849_v6  ;;  %v1040_v39 = vadd.f32 %v1548_v37, %v1851_v7  ;;  %v864_v40 = vpop.f32.mrb[15].mxu1  ;;  %v1034_v41 = vpop.f32.mrb[15].mxu0 }
 0x109   : > { %v865_v42 = vadd.f32 %v1849_v6, %v864_v40  ;;  %v1035_v43 = vadd.f32 %v1851_v7, %v1034_v41 }
 0x10a   : > { %920 = vst.msk [vmem:[%s1857_s18 + $0x38] sm:$0xff] %vm742_vm1, %v870_v38  ;;  %1090 = vst.msk [vmem:[%s1863_s21 + $0x38] sm:$0xff] %vm742_vm1, %v1040_v39 }
 0x10b   : > { %919 = vst.msk [vmem:[%s1857_s18 + $0x30] sm:$0xff] %vm742_vm1, %v865_v42  ;;  %1089 = vst.msk [vmem:[%s1863_s21 + $0x30] sm:$0xff] %vm742_vm1, %v1035_v43  ;;  %v1523_v44 = vpop.f32.mrb[16].mxu1  ;;  %v1551_v45 = vpop.f32.mrb[16].mxu0 }
 0x10c   : > { %v880_v46 = vadd.f32 %v1523_v44, %v1849_v6  ;;  %v1050_v47 = vadd.f32 %v1551_v45, %v1851_v7  ;;  %v874_v48 = vpop.f32.mrb[17].mxu1  ;;  %v1044_v49 = vpop.f32.mrb[17].mxu0 }
 0x10d   : > { %v875_v50 = vadd.f32 %v1849_v6, %v874_v48  ;;  %v1045_v51 = vadd.f32 %v1851_v7, %v1044_v49 }
 0x10e   : > { %922 = vst.msk [vmem:[%s1857_s18 + $0x48] sm:$0xff] %vm742_vm1, %v880_v46  ;;  %1092 = vst.msk [vmem:[%s1863_s21 + $0x48] sm:$0xff] %vm742_vm1, %v1050_v47 }
 0x10f   : > { %921 = vst.msk [vmem:[%s1857_s18 + $0x40] sm:$0xff] %vm742_vm1, %v875_v50  ;;  %1091 = vst.msk [vmem:[%s1863_s21 + $0x40] sm:$0xff] %vm742_vm1, %v1045_v51  ;;  %v1526_v52 = vpop.f32.mrb[18].mxu1  ;;  %v1554_v53 = vpop.f32.mrb[18].mxu0 }
 0x110   : > { %v890_v54 = vadd.f32 %v1526_v52, %v1849_v6  ;;  %v1060_v55 = vadd.f32 %v1554_v53, %v1851_v7  ;;  %v884_v56 = vpop.f32.mrb[19].mxu1  ;;  %v1054_v57 = vpop.f32.mrb[19].mxu0 }
 0x111   : > { %v885_v58 = vadd.f32 %v1849_v6, %v884_v56  ;;  %v1055_v59 = vadd.f32 %v1851_v7, %v1054_v57 }
 0x112   : > { %924 = vst.msk [vmem:[%s1857_s18 + $0x58] sm:$0xff] %vm742_vm1, %v890_v54  ;;  %1094 = vst.msk [vmem:[%s1863_s21 + $0x58] sm:$0xff] %vm742_vm1, %v1060_v55 }
 0x113   : > { %923 = vst.msk [vmem:[%s1857_s18 + $0x50] sm:$0xff] %vm742_vm1, %v885_v58  ;;  %1093 = vst.msk [vmem:[%s1863_s21 + $0x50] sm:$0xff] %vm742_vm1, %v1055_v59  ;;  %v1529_v60 = vpop.f32.mrb[20].mxu1  ;;  %v1557_v61 = vpop.f32.mrb[20].mxu0 }
 0x114   : > { %v900_v62 = vadd.f32 %v1529_v60, %v1849_v6  ;;  %v1070_v63 = vadd.f32 %v1557_v61, %v1851_v7  ;;  %v894_v0 = vpop.f32.mrb[21].mxu1  ;;  %v1064_v1 = vpop.f32.mrb[21].mxu0 }
 0x115   : > { %v895_v2 = vadd.f32 %v1849_v6, %v894_v0  ;;  %v1065_v3 = vadd.f32 %v1851_v7, %v1064_v1 }
 0x116   : > { %926 = vst.msk [vmem:[%s1857_s18 + $0x68] sm:$0xff] %vm742_vm1, %v900_v62  ;;  %1096 = vst.msk [vmem:[%s1863_s21 + $0x68] sm:$0xff] %vm742_vm1, %v1070_v63 }
 0x117   : > { %925 = vst.msk [vmem:[%s1857_s18 + $0x60] sm:$0xff] %vm742_vm1, %v895_v2  ;;  %1095 = vst.msk [vmem:[%s1863_s21 + $0x60] sm:$0xff] %vm742_vm1, %v1065_v3  ;;  %v1532_v4 = vpop.f32.mrb[22].mxu1  ;;  %v1560_v5 = vpop.f32.mrb[22].mxu0 }
 0x118   : > { %v910_v8 = vadd.f32 %v1532_v4, %v1849_v6  ;;  %v1080_v9 = vadd.f32 %v1560_v5, %v1851_v7  ;;  %v904_v10 = vpop.f32.mrb[23].mxu1  ;;  %v1074_v11 = vpop.f32.mrb[23].mxu0 }
 0x119   : > { %v905_v12 = vadd.f32 %v1849_v6, %v904_v10  ;;  %v1075_v13 = vadd.f32 %v1851_v7, %v1074_v11 }
 0x11a   : > { %928 = vst.msk [vmem:[%s1857_s18 + $0x78] sm:$0xff] %vm742_vm1, %v910_v8  ;;  %1098 = vst.msk [vmem:[%s1863_s21 + $0x78] sm:$0xff] %vm742_vm1, %v1080_v9 }
 0x11b   : > { %927 = vst.msk [vmem:[%s1857_s18 + $0x70] sm:$0xff] %vm742_vm1, %v905_v12  ;;  %1097 = vst.msk [vmem:[%s1863_s21 + $0x70] sm:$0xff] %vm742_vm1, %v1075_v13 }
 0x11c PF: > { %s20_s11 = sadd.s32 1, %s1621_s11   ;;  %s1988_s30 = smov %s1617_s10 }
 0x11d   : > { %p17_p5 = scmp.ge.s32.totalorder %s20_s11, 6   ;;  %s1989_s10 = smov %s1991_s12 }
 0x11f   :  { %19 = sbr.rel (!%p17_p5) target bundleno = 2 (0x2), region = 120 }

</bundles_post_ra>
